<compile_context>
chip_gen: v6e
topology: v6e:2x2x1
jax: 0.10.0
libtpu: 0.0.40
codegen_flags: <defaults>
</compile_context>

<pallas_src>
import jax
import jax.numpy as jnp
from jax.experimental import pallas as pl
from jax.experimental.pallas import tpu as pltpu

_LANE = 128
_MIN_GRID = 8  # >= ~4 pipelined steps per TensorCore on v7x (2 TCs/chip)


def _round_up(a, b):
    return ((a + b - 1) // b) * b


def _round_down(a, b):
    return (a // b) * b


def _sublane_for_dtype(dtype):
    # Packed dtypes pack along sublanes: min native tile is (8,128) for 4-byte,
    # (16,128) for bf16/f16, (32,128) for int8/fp8.
    itemsize = jnp.dtype(dtype).itemsize
    return max(8, 32 // max(1, itemsize))


def _choose_tile_rows(rows, sublane, max_tile_rows):
    """Pick a row tile (multiple of `sublane`) that
       * stays under the per-tile VMEM cap (`max_tile_rows` rows),
       * yields >= _MIN_GRID grid steps when the input is large enough, and
       * prefers an even number of grid steps (v7x has 2 TensorCores)."""
    rows_r = _round_up(rows, sublane)
    cap = max(sublane, _round_down(max_tile_rows, sublane))
    max_blocks = max(1, rows_r // sublane)
    target_blocks = max(1, min(_MIN_GRID, max_blocks))
    tr = max(sublane, _round_down(rows_r // target_blocks, sublane))
    tr = min(tr, cap, rows_r)
    nb = pl.cdiv(rows_r, tr)
    if nb > 1 and nb % 2 == 1:
        # Shrink the tile slightly so the step count becomes even (equal work
        # for both v7x TensorCores); negligible cost on other generations.
        tr_even = max(sublane, _round_up(pl.cdiv(rows_r, nb + 1), sublane))
        if tr_even <= cap and pl.cdiv(rows_r, tr_even) % 2 == 0:
            tr = tr_even
    return tr


def _sigmoid_kernel(x_ref, o_ref):
    # sigmoid(x) = 1 / (1 + e ** (-x)); exact divide keeps error <= 1e-6.
    x = x_ref[...].astype(jnp.float32)
    o_ref[...] = (1.0 / (1.0 + jnp.exp(-x))).astype(o_ref.dtype)


def _block_spec(shape, index_map, deep_pipeline):
    if deep_pipeline and hasattr(pl, "Buffered"):
        try:  # 3-deep buffering hides per-step DMA issue latency when streaming
            return pl.BlockSpec(shape, index_map, pipeline_mode=pl.Buffered(3))
        except TypeError:  # pipeline_mode not supported in this Pallas version
            pass
    return pl.BlockSpec(shape, index_map)


def sigmoid_forward(x, *, max_tile_rows=2048):
    """Elementwise sigmoid via a Pallas TPU kernel (the module's forward pass)."""
    orig_shape = x.shape
    orig_dtype = x.dtype
    itemsize = jnp.dtype(orig_dtype).itemsize
    sublane = _sublane_for_dtype(orig_dtype)

    flat = x.reshape(-1)
    n = flat.shape[0]

    # Lane-dense slab [rows, 128]. Only pad the sub-128 tail (ragged sizes) and
    # tiny inputs up to one (sublane, 128) tile; no row padding otherwise --
    # Pallas masks the partial boundary block.
    n_pad = max(_round_up(n, _LANE), sublane * _LANE)
    needs_pad = n_pad != n
    if needs_pad:
        flat = jnp.pad(flat, (0, n_pad - n))
    rows = n_pad // _LANE
    slab = flat.reshape(rows, _LANE)

    tr = _choose_tile_rows(rows, sublane, max_tile_rows)
    num_blocks = pl.cdiv(rows, tr)
    deep_pipeline = num_blocks >= 4

    cost = pl.CostEstimate(
        flops=3 * n,             # neg, add, divide
        transcendentals=n,       # one exp per element
        bytes_accessed=2 * n * itemsize,
    )

    out = pl.pallas_call(
        _sigmoid_kernel,
        out_shape=jax.ShapeDtypeStruct((rows, _LANE), orig_dtype),
        grid_spec=pltpu.PrefetchScalarGridSpec(
            num_scalar_prefetch=0,
            grid=(num_blocks,),
            in_specs=[_block_spec((tr, _LANE), lambda i: (i, 0), deep_pipeline)],
            out_specs=_block_spec((tr, _LANE), lambda i: (i, 0), deep_pipeline),
        ),
        compiler_params=pltpu.CompilerParams(
            dimension_semantics=("parallel",)),
        cost_estimate=cost,
    )(slab)

    if needs_pad:
        return out.reshape(-1)[:n].reshape(orig_shape)
    return out.reshape(orig_shape)


if __name__ == "__main__":
    key = jax.random.PRNGKey(0)

    # NCHW input consistent with the module's typical use.
    x = jax.random.normal(key, (2, 4, 16, 16), dtype=jnp.float32)
    y = sigmoid_forward(x)
    jax.block_until_ready(y)
    ref = 1.0 / (1.0 + jnp.exp(-x))
    assert y.shape == x.shape and y.dtype == x.dtype
    assert jnp.allclose(y, ref, atol=1e-6, rtol=1e-6)

    # Ragged size (exercises the lane-pad / slice path).
    x2 = jax.random.normal(jax.random.PRNGKey(1), (3, 5, 7), dtype=jnp.float32)
    y2 = sigmoid_forward(x2)
    jax.block_until_ready(y2)
    assert jnp.allclose(y2, 1.0 / (1.0 + jnp.exp(-x2)), atol=1e-6, rtol=1e-6)

    # Larger (still small) input: multi-step grid + deeper pipelining path.
    x3 = jax.random.normal(jax.random.PRNGKey(2), (8, 4, 32, 32), dtype=jnp.float32)
    y3 = sigmoid_forward(x3)
    jax.block_until_ready(y3)
    assert jnp.allclose(y3, 1.0 / (1.0 + jnp.exp(-x3)), atol=1e-6, rtol=1e-6)

    # bf16 input: exercises dtype-aware sublane rounding (16 sublanes).
    x4 = jax.random.normal(jax.random.PRNGKey(3), (4, 8, 128), dtype=jnp.bfloat16)
    y4 = sigmoid_forward(x4)
    jax.block_until_ready(y4)
    ref4 = (1.0 / (1.0 + jnp.exp(-x4.astype(jnp.float32)))).astype(jnp.bfloat16)
    assert y4.dtype == x4.dtype
    assert jnp.allclose(y4.astype(jnp.float32), ref4.astype(jnp.float32),
                        atol=1e-2, rtol=1e-2)

    print("KERNEL_OK")
</pallas_src>

<mosaic_0001>
module attributes {stable_mosaic.version = 11 : i64} {
  func.func @_sigmoid_kernel(%arg0: i32, %arg1: memref<8x128xf32, #tpu.memory_space<vmem>>, %arg2: memref<8x128xf32, #tpu.memory_space<vmem>>) attributes {dimension_semantics = [#tpu.dimension_semantics<parallel>], iteration_bounds = array<i64: 2>, scalar_prefetch = 0 : i64, scratch_operands = 0 : i64, tpu.core_type = #tpu.core_type<tc>, window_params = [{transform_indices = @transform_0, window_bounds = array<i64: 8, 128>}, {transform_indices = @transform_1, window_bounds = array<i64: 8, 128>}]} {
    %c0 = arith.constant 0 : index
    %c0_0 = arith.constant 0 : index
    %0 = vector.load %arg1[%c0, %c0_0] : memref<8x128xf32, #tpu.memory_space<vmem>>, vector<8x128xf32>
    %cst = arith.constant 0.000000e+00 : f32
    %1 = vector.broadcast %cst : f32 to vector<8x128xf32>
    %2 = arith.subf %1, %0 : vector<8x128xf32>
    %3 = math.exp %2 : vector<8x128xf32>
    %cst_1 = arith.constant 1.000000e+00 : f32
    %4 = vector.broadcast %cst_1 : f32 to vector<8x128xf32>
    %5 = arith.addf %4, %3 : vector<8x128xf32>
    %cst_2 = arith.constant 1.000000e+00 : f32
    %6 = vector.broadcast %cst_2 : f32 to vector<8x128xf32>
    %7 = arith.divf %6, %5 : vector<8x128xf32>
    %c0_3 = arith.constant 0 : index
    %c0_4 = arith.constant 0 : index
    %8 = vector.load %arg2[%c0_3, %c0_4] : memref<8x128xf32, #tpu.memory_space<vmem>>, vector<8x128xf32>
    tpu.vector_store %arg2[%c0_3, %c0_4], %7 {strides = array<i32>} : memref<8x128xf32, #tpu.memory_space<vmem>>, vector<8x128xf32>,
    return
  }
  func.func @transform_0(%arg0: i32) -> (i32, i32) {
    %c0_i32 = arith.constant 0 : i32
    %c0_i32_0 = arith.constant 0 : i32
    return %arg0, %c0_i32 : i32, i32
  }
  func.func @transform_1(%arg0: i32) -> (i32, i32) {
    %c0_i32 = arith.constant 0 : i32
    %c0_i32_0 = arith.constant 0 : i32
    return %arg0, %c0_i32 : i32, i32
  }
}

</mosaic_0001>

<bundles_post_ra>
// kernel: tpu_custom_call.1
= control target key start
LH: loop header
LB: loop body
LE: loop exit
PB: predicated region body
PF: predicated region fallthrough
CT: control target
= control target key end

     0   :  { %6 = vsyncpa [#allocation3], 0  ;;  %s539_s0 = inlined_call_operand.hbm [shape: f32[16,128], index: 0, kind: input, shape index: {}]   ;;  %s540_s1 = inlined_call_operand.hbm [shape: f32[16,128], index: 1, kind: output, shape index: {}]  }
   0x1   :  { %8 = vsyncpa [#allocation3 + $0x1], 0 }
   0x2   :  { %9 = vsyncpa [#allocation4], 0 }
   0x3   :  { %11 = vsyncpa [#allocation4 + $0x1], 0  ;;  %s392_s6 = smov 0   ;;  %s394_s7 = smov 0  }
   0x4   :  { %s396_s8 = smov 0   ;;  %s398_s9 = smov 0  }
   0x5 LB: > { %s413_s10 = sadd.s32 4294967295, %s378_s9   ;;  %s224_s11 = sadd.s32 4294967294, %s378_s9   ;;  %s378_s9 = sphi %s398_s9, %s557_s9   ;;  %s374_s8 = sphi %s396_s8, %s556_s8   ;;  %s370_s7 = sphi %s394_s7, %s555_s7   ;;  %s366_s6 = sphi %s392_s6, %s554_s6  }
   0x6   : > { %s417_s12 = sadd.s32 1, %s378_s9   ;;  %s24_s13 = sadd.s32 1, %s374_s8 }
   0x7   : > { %s21_s14 = ssub.s32 %s378_s9, %s417_s12  ;;  %p31_p0 = scmp.ne.s32.totalorder %s374_s8, %s370_s7 }
   0x8   : > { %p22_p1 = scmp.eq.s32.totalorder %s21_s14, 0  ;;  %p32_p2 = scmp.eq.s32.totalorder %s378_s9, 0 }
   0x9   : > { %p37_p3 = scmp.ne.s32.totalorder %s370_s7, %s366_s6  ;;  %p38_p4 = scmp.eq.s32.totalorder %s413_s10, 0 }
   0xa   : > { %s429_s15 = scalar_select %p22_p1, %s374_s8, %s24_s13  }
   0xb   : > { %p431_p5 = por %p32_p2, %p31_p0  ;;  %p435_p6 = por %p38_p4, %p37_p3 }
   0xc   : > { %p61_p7 = scmp.eq.s32.totalorder %s413_s10, 1  ;;  %p67_p8 = scmp.eq.s32.totalorder %s224_s11, 1 }
   0xd   : > { %s544_s17 = scalar_select %p435_p6, 1, 0 }
   0xe   : > { %p248_p10 = scmp.lt.s32.totalorder %s378_s9, 2  ;;  %p442_p11 = por %p61_p7, %p31_p0 }
   0xf   : > { %p446_p12 = por %p67_p8, %p37_p3  ;;  %s87_s20 = sand.u32 1, %s374_s8  }
  0x10   : > { %s545_s18 = scalar_select %p442_p11, 1, 0 }
  0x11   : > { %s546_s19 = scalar_select %p446_p12, 1, 0 }
  0x12   : > { %s228_s21 = sshll.u32 %s378_s9, 7  ;;  %s227_s22 = sshll.u32 %s87_s20, 3 }
  0x13   : > { %s455_s25 = scalar_lea.hbm %s539_s0, %s228_s21  ;;  %s91_s26 = scalar_lea.vmem [#allocation2], %s227_s22 }
  0x14   : > { %s98_s27 = sshll.u32 %s91_s26, 4  ;;  %p459_p13 = pnand %p248_p10, %p431_p5  ;;  %s463_s27 = int_to_ptr.vmem [resolvable:$true] %s98_s27 }
  0x15   : > { %s88_s29 = scalar_lea.sflag [#allocation3], %s87_s20  ;;  %s286_s30 = scalar_lea.hbm %s455_s25, 128 }
  0x16   : > { %p287_p2 = scmp.ne.s32.totalorder %s455_s25, %s286_s30  ;;  %p288_p3 = pneg %p459_p13 }
  0x17   : > { %s291_s4 = scalar_lea.hbm %s539_s0, 256  ;;  %p292_p5 = scmp.lt.s32.totalorder %s455_s25, %s539_s0 }
  0x18   : > { %p289_p4 = pnand %p288_p3, %p287_p2  ;;  %p293_p8 = scmp.lt.s32.totalorder %s291_s4, %s286_s30 }
  0x1a   : > { %p290_p7 = pneg %p289_p4  ;;  %p294_p10 = por %p293_p8, %p292_p5 }
  0x1c   : > { %p295_p9 = pnand %p294_p10, %p290_p7 }
  0x1e   : > { %298 = shalt.err (!%p295_p9)
}
  0x1f   : > { %s299_s13 = scalar_lea.vmem %s463_s27, 128  ;;  %s380_s14 = smov [#allocation2]  }
  0x20   : > { %p300_p0 = scmp.ne.s32.totalorder %s463_s27, %s299_s13  ;;  %s304_s16 = sshll.u32 %s380_s14, 4  ;;  %s305_s16 = int_to_ptr.vmem [resolvable:$false] %s304_s16 }
  0x21   : > { %s306_s20 = scalar_lea.vmem %s305_s16, 256  ;;  %p307_p4 = scmp.lt.s32.totalorder %s463_s27, %s305_s16 }
  0x22   : > { %p302_p1 = pnand %p300_p0, %p288_p3  ;;  %p308_p12 = scmp.lt.s32.totalorder %s306_s20, %s299_s13 }
  0x24   : > { %p303_p2 = pneg %p302_p1  ;;  %p309_p11 = por %p308_p12, %p307_p4 }
  0x26   : > { %p310_p6 = pnand %p309_p11, %p303_p2 }
  0x28   : > { %313 = shalt.err (!%p310_p6)
}
  0x29   : > { %243 = dma.hbm_to_vmem [thread:$0]  (!%p459_p13), %s455_s25, 128, %s463_s27, %s88_s29  }
  0x2a   : > { %p548_p9 = scmp.lt.s32.totalorder %s378_s9, 3  ;;  %p549_p7 = scmp.ge.s32.totalorder %s378_s9, 1 }
  0x2c   : > { %p104_p0 = pnand %p549_p7, %p548_p9 }
  0x2d   : > { %s490_s21 = sand.u32 (!%p104_p0), 1, %s370_s7   ;;  %p550_p6 = scmp.ne.s32.totalorder (!%p104_p0), %s544_s17, 0 }
  0x2e   : > { %107 = sbr.rel (%p104_p0) target bundleno = 100 (0x64), region = 24  ;;  %s230_s22 = sshll.u32 (!%p104_p0), %s490_s21, 3 }
  0x2f   : > { %s110_s23 = scalar_lea.sflag (!%p104_p0), [#allocation3], %s490_s21  ;;  %s113_s24 = scalar_lea.vmem (!%p104_p0), [#allocation2], %s230_s22 }
  0x33   : > { %357 = dma.done.wait (%p550_p6), %s110_s23, 128  }
  0x34   : > { %359 = vsyncadd (%p550_p6), %s110_s23, 4294967168  ;;  %v132_v0 = vld [vmem:[%s113_s24] sm:$0xff]  ;;  %s131_s25 = scalar_lea.vmem [#allocation5], %s230_s22  ;;  %s233_s27 = sshll.u32 %s413_s10, 7 }
  0x35   : > { %v133_v1 = vsub.f32 0.0, %v132_v0  ;;  %s154_s26 = sshll.u32 %s131_s25, 4  ;;  %s152_s17 = scalar_lea.hbm %s540_s1, %s233_s27  ;;  %s499_s26 = int_to_ptr.vmem [resolvable:$true] %s154_s26 }
  0x36   : > { %s141_s30 = scalar_lea.sflag [#allocation4], %s490_s21  ;;  %s314_s2 = scalar_lea.vmem %s499_s26, 128 }
  0x37   : > { %v134_v2 = vmul.f32 1.442695, %v133_v1  ;;  %p315_p11 = scmp.ne.s32.totalorder %s499_s26, %s314_s2  ;;  %p551_p12 = scmp.ne.s32.totalorder %s545_s18, 0 }
  0x38   : > { %s381_s3 = smov [#allocation5]  }
  0x39   : > { %282 = vpow2.f32 %v134_v2  ;;  %p316_p13 = pnand %p315_p11, %p551_p12  ;;  %s318_s4 = sshll.u32 %s381_s3, 4  ;;  %s319_s4 = int_to_ptr.vmem [resolvable:$false] %s318_s4 }
  0x3a   : > { %s320_s10 = scalar_lea.vmem %s319_s4, 256  ;;  %p321_p3 = scmp.lt.s32.totalorder %s499_s26, %s319_s4 }
  0x3b   : > { %p317_p1 = pneg %p316_p13  ;;  %p322_p5 = scmp.lt.s32.totalorder %s320_s10, %s314_s2 }
  0x3d   : > { %p323_p8 = por %p322_p5, %p321_p3 }
  0x3f   : > { %p324_p10 = pnand %p323_p8, %p317_p1 }
  0x46   : > { %v283_v3 = vpop.eup %282 }
  0x47   : > { %v136_v4 = vadd.f32 1.0, %v283_v3 }
  0x49   : > { %284 = vrcp.f32 %v136_v4 }
  0x56   : > { %v285_v5 = vpop.eup %284 }
  0x57   : > { %139 = vst [vmem:[%s131_s25] sm:$0xff] %v285_v5 }
  0x58   : > { %327 = shalt.err (!%p324_p10)
}
  0x59   : > { %s328_s5 = scalar_lea.hbm %s152_s17, 128  ;;  %s332_s14 = scalar_lea.hbm %s540_s1, 256 }
  0x5a   : > { %p329_p2 = scmp.ne.s32.totalorder %s152_s17, %s328_s5  ;;  %p333_p7 = scmp.lt.s32.totalorder %s152_s17, %s540_s1 }
  0x5b   : > { %p334_p0 = scmp.lt.s32.totalorder %s332_s14, %s328_s5 }
  0x5c   : > { %p330_p4 = pnand %p329_p2, %p551_p12 }
  0x5d   : > { %p335_p6 = por %p334_p0, %p333_p7 }
  0x5e   : > { %p331_p9 = pneg %p330_p4 }
  0x60   : > { %p336_p11 = pnand %p335_p6, %p331_p9 }
  0x62   : > { %339 = shalt.err (!%p336_p11)
}
  0x63   : > { %238 = dma.vmem_to_hbm [thread:$0]  (%p551_p12), %s499_s26, 128, %s152_s17, %s141_s30  }
  0x64 PF: > { %s166_s21 = sand.u32 1, %s366_s6   ;;  %p552_p13 = scmp.ne.s32.totalorder %s546_s19, 0 }
  0x65   : > { %p553_p1 = scmp.ge.s32.totalorder %s378_s9, 2  ;;  %s167_s22 = scalar_lea.sflag [#allocation4], %s166_s21 }
  0x67   : > { %p245_p3 = pnand %p553_p1, %p552_p13 }
  0x69   : > { %p246_p5 = pneg %p245_p3 }
  0x6b   : > { %361 = dma.done.wait (%p246_p5), %s167_s22, 128  }
  0x6c   : > { %363 = vsyncadd (%p246_p5), %s167_s22, 4294967168  ;;  %p14_p8 = scmp.ge.s32.totalorder %s417_s12, 4   ;;  %s554_s6 = smov %s370_s7 }
  0x6d   : > { %s555_s7 = smov %s374_s8  ;;  %s556_s8 = smov %s429_s15 }
  0x6e   : > { %s557_s9 = smov %s417_s12  ;;  %16 = sbr.rel (!%p14_p8) target bundleno = 5 (0x5), region = 69 }
  0x73   :  { %172 = vsyncpa [#allocation3], 1 }
  0x74   :  { %174 = vsyncpa [#allocation3 + $0x1], 1 }
  0x75   :  { %175 = vsyncpa [#allocation4], 1 }
  0x76   :  { %177 = vsyncpa [#allocation4 + $0x1], 1 }

</bundles_post_ra>
